<compile_context>
chip_gen: v7x
topology: tpu7x:2x2x1
jax: 0.10.0
libtpu: 0.0.40
codegen_flags: <defaults>
</compile_context>

<pallas_src>
import jax
import jax.numpy as jnp
from jax import lax
from jax.experimental import pallas as pl
from jax.experimental.pallas import tpu as pltpu


def _round_up(x, m):
    return ((x + m - 1) // m) * m


def _vmem_capacity_bytes():
    try:
        return int(pltpu.get_tpu_info().vmem_capacity_bytes)
    except Exception:
        return 64 << 20  # conservative default (v7x per-TC VMEM)


# --------------------------------------------------------------------------
# Kernel
# --------------------------------------------------------------------------
def _value_mlp_kernel(x_ref, w1_ref, b1_ref, w2_ref, b2_ref, w3_ref, b3_ref,
                      out_ref):
    # x tile: (TILE_B, I) f32 straight from HBM; cast to bf16 in VMEM (no
    # padded bf16 copy of x is ever written back to HBM).
    x = x_ref[...].astype(jnp.bfloat16)

    h1 = jnp.dot(x, w1_ref[...], preferred_element_type=jnp.float32)
    h1 = jnp.maximum(h1 + b1_ref[...], 0.0)                  # bias + ReLU, f32 VPU

    h2 = jnp.dot(h1.astype(jnp.bfloat16), w2_ref[...],
                 preferred_element_type=jnp.float32)
    h2 = jnp.maximum(h2 + b2_ref[...], 0.0)                  # bias + ReLU, f32 VPU

    # Final single-output layer: contract the (1, H_pad) w3 row against h2 on
    # the MXU so the result is already lane-dense (1, TILE_B); avoids the XLU
    # cross-lane reduce + relayout of the previous VPU-sum path.
    val = lax.dot_general(
        w3_ref[...], h2.astype(jnp.bfloat16),
        dimension_numbers=(((1,), (1,)), ((), ())),
        preferred_element_type=jnp.float32)                  # (1, TILE_B)

    out_ref[...] = (val + b3_ref[0, 0]).reshape(1, 1, -1)


# --------------------------------------------------------------------------
# One-time parameter preparation (hoisted out of the per-call forward path)
# --------------------------------------------------------------------------
def prepare_value_network_params(params):
    """Pad + cast weights ONCE. Weights are stored (in, out), i.e. x @ W."""
    w1 = jnp.asarray(params["w1"], jnp.float32)
    w2 = jnp.asarray(params["w2"], jnp.float32)
    w3 = jnp.asarray(params["w3"], jnp.float32)
    I, H = w1.shape
    H_pad = _round_up(H, 128)
    # Zero padding is exact: padded hidden units get zero weights + zero bias,
    # and padded w3 columns contribute nothing. The input dim of w1 stays at I
    # (the x block carries the full feature dim, so x is never feature-padded).
    return {
        "num_inputs": I,
        "hidden_dim": H,
        "hidden_pad": H_pad,
        "w1": jnp.zeros((I, H_pad), jnp.bfloat16).at[:, :H].set(
            w1.astype(jnp.bfloat16)),
        "w2": jnp.zeros((H_pad, H_pad), jnp.bfloat16).at[:H, :H].set(
            w2.astype(jnp.bfloat16)),
        "w3": jnp.zeros((1, H_pad), jnp.bfloat16).at[:, :H].set(
            w3.reshape(1, -1).astype(jnp.bfloat16)),
        "b1": jnp.zeros((1, H_pad), jnp.float32).at[:, :H].set(
            jnp.asarray(params["b1"], jnp.float32).reshape(1, -1)),
        "b2": jnp.zeros((1, H_pad), jnp.float32).at[:, :H].set(
            jnp.asarray(params["b2"], jnp.float32).reshape(1, -1)),
        "b3": jnp.asarray(params["b3"], jnp.float32).reshape(1, 1),  # -> SMEM
    }


# --------------------------------------------------------------------------
# Tile-size heuristic (generation-aware via real VMEM capacity)
# --------------------------------------------------------------------------
def _choose_tile_b(B, I, H_pad, vmem_cap):
    if B < 128:
        # Latency regime (small RL batches): pad only to a sublane multiple and
        # accept a small masked store on the tiny lane-dense output block.
        return _round_up(max(B, 1), 8)

    budget = int(vmem_cap * 0.7) - (8 << 20)          # headroom for compiler scratch
    # Single-buffered resident weights / biases.
    resident = (I * H_pad + H_pad * H_pad + H_pad) * 2 + 2 * H_pad * 4 + 1024
    per_row = (
        2 * I * 4            # x tile, f32, double-buffered
        + I * 2              # bf16 cast of x
        + 2 * H_pad * 4      # h1 / h2 f32 intermediates
        + 2 * H_pad * 2      # bf16 casts of h1 / h2
        + 2 * 4              # output, double-buffered
    )
    tile_b = 128
    for cand in (2048, 1024, 512, 256, 128):          # big tiles amortize the
        if resident + cand * per_row <= budget:       # ~0.35us/step overhead
            tile_b = cand
            break
    tile_b = min(tile_b, _round_up(B, 128))
    # Keep >= 2 grid steps when possible so the "parallel" batch axis has two
    # tiles to shard across v7x's two TensorCores.
    if tile_b >= 256 and _round_up(B, tile_b) // tile_b < 2:
        tile_b = max(128, tile_b // 2)
    return tile_b


# --------------------------------------------------------------------------
# Forward
# --------------------------------------------------------------------------
def value_network_forward(state, prepared, *, tile_b=None):
    """Forward pass. `prepared` comes from prepare_value_network_params()."""
    B = state.shape[0]
    x = state.reshape(B, -1).astype(jnp.float32)
    I = x.shape[1]
    assert I == prepared["num_inputs"], "state feature dim mismatch"
    H_pad = prepared["hidden_pad"]

    vmem_cap = _vmem_capacity_bytes()
    if tile_b is None:
        tile_b = _choose_tile_b(B, I, H_pad, vmem_cap)
    B_pad = _round_up(B, tile_b)
    num_tiles = B_pad // tile_b

    # Batch-pad only when needed (zero rows are discarded by the final slice).
    if B_pad != B:
        x = jnp.zeros((B_pad, I), jnp.float32).at[:B].set(x)

    w1, b1 = prepared["w1"], prepared["b1"]
    w2, b2 = prepared["w2"], prepared["b2"]
    w3, b3 = prepared["w3"], prepared["b3"]

    # Explicit VMEM budget, clamped to this generation's physical capacity.
    vmem_bytes = (
        2 * tile_b * I * 4                          # x, double-buffered, f32
        + (w1.size + w2.size + w3.size) * 2         # resident bf16 weights
        + (b1.size + b2.size) * 4                   # resident f32 biases
        + 3 * tile_b * H_pad * 4                    # live f32 intermediates
        + 2 * tile_b * 4                            # output, double-buffered
    )
    vmem_limit = min(max(int(vmem_bytes * 1.25) + (4 << 20), 32 << 20),
                     vmem_cap - (8 << 20))

    cost = pl.CostEstimate(
        flops=2 * B_pad * (I * H_pad + H_pad * H_pad + H_pad),
        transcendentals=0,
        bytes_accessed=(x.size * 4 + (w1.size + w2.size + w3.size) * 2
                        + (b1.size + b2.size + b3.size) * 4 + B_pad * 4),
    )

    def make_in_specs(single_buffer_weights):
        kw = {"pipeline_mode": pl.Buffered(1)} if single_buffer_weights else {}
        return [
            pl.BlockSpec((tile_b, I), lambda i: (i, 0)),            # x: batch-tiled
            pl.BlockSpec((I, H_pad), lambda i: (0, 0), **kw),       # w1 resident
            pl.BlockSpec((1, H_pad), lambda i: (0, 0), **kw),       # b1 resident
            pl.BlockSpec((H_pad, H_pad), lambda i: (0, 0), **kw),   # w2 resident
            pl.BlockSpec((1, H_pad), lambda i: (0, 0), **kw),       # b2 resident
            pl.BlockSpec((1, H_pad), lambda i: (0, 0), **kw),       # w3 resident
            pl.BlockSpec(memory_space=pltpu.MemorySpace.SMEM),      # b3 scalar
        ]

    def build(single_buffer_weights):
        return pl.pallas_call(
            _value_mlp_kernel,
            out_shape=jax.ShapeDtypeStruct((num_tiles, 1, tile_b), jnp.float32),
            grid=(num_tiles,),
            in_specs=make_in_specs(single_buffer_weights),
            out_specs=pl.BlockSpec((1, 1, tile_b), lambda i: (i, 0, 0)),
            compiler_params=pltpu.CompilerParams(
                dimension_semantics=("parallel",),   # megacore sharding on v7x
                vmem_limit_bytes=vmem_limit,
            ),
            cost_estimate=cost,
        )

    try:
        out = build(True)(x, w1, b1, w2, b2, w3, b3)
    except Exception:
        # pipeline_mode=pl.Buffered(1) not supported by this jax/libtpu combo:
        # fall back to default buffering of the constant-index weight blocks.
        out = build(False)(x, w1, b1, w2, b2, w3, b3)

    # (num_tiles, 1, TILE_B) lane-dense slab -> (B, 1)
    return out.reshape(-1)[:B].reshape(B, 1)


# --------------------------------------------------------------------------
# Init (matches PyTorch weights_init_: Xavier-uniform gain=1, zero biases)
# --------------------------------------------------------------------------
def init_value_network_params(key, num_inputs, hidden_dim):
    def xavier(k, fan_in, fan_out):
        bound = (6.0 / (fan_in + fan_out)) ** 0.5
        # stored as (in, out) so the kernel computes x @ W (== PyTorch x @ W.T)
        return jax.random.uniform(k, (fan_in, fan_out), jnp.float32,
                                  minval=-bound, maxval=bound)

    k1, k2, k3 = jax.random.split(key, 3)
    return {
        "w1": xavier(k1, num_inputs, hidden_dim),
        "b1": jnp.zeros((1, hidden_dim), jnp.float32),
        "w2": xavier(k2, hidden_dim, hidden_dim),
        "b2": jnp.zeros((1, hidden_dim), jnp.float32),
        "w3": xavier(k3, hidden_dim, 1),
        "b3": jnp.zeros((1, 1), jnp.float32),
    }


if __name__ == "__main__":
    key = jax.random.PRNGKey(0)
    k_state, k_params = jax.random.split(key)

    # Small shapes: state (B=2, C=4, H=2, W=2) -> num_inputs=16, hidden=32
    B, C, H, W = 2, 4, 2, 2
    num_inputs = C * H * W
    hidden_dim = 32

    state = jax.random.normal(k_state, (B, C, H, W), jnp.float32)
    params = init_value_network_params(k_params, num_inputs, hidden_dim)
    prepared = prepare_value_network_params(params)   # one-time pad/cast

    out = value_network_forward(state, prepared)
    out = jax.block_until_ready(out)

    # Pure-JAX f32 reference of the same math (PyTorch semantics).
    x = state.reshape(B, -1)
    r = jnp.maximum(x @ params["w1"] + params["b1"], 0.0)
    r = jnp.maximum(r @ params["w2"] + params["b2"], 0.0)
    r = r @ params["w3"] + params["b3"]

    assert out.shape == (B, 1)
    # bf16 matmul operands with f32 accumulation -> loose-but-tight tolerance.
    assert jnp.allclose(out, r, rtol=2e-2, atol=2e-2), "mismatch vs reference"

    print("KERNEL_OK")
</pallas_src>

<mosaic_0001>
module attributes {stable_mosaic.version = 11 : i64} {
  func.func @_value_mlp_kernel(%arg0: i32, %arg1: memref<8x16xf32, #tpu.memory_space<vmem>>, %arg2: memref<16x128xbf16, #tpu.memory_space<vmem>>, %arg3: memref<1x128xf32, #tpu.memory_space<vmem>>, %arg4: memref<128x128xbf16, #tpu.memory_space<vmem>>, %arg5: memref<1x128xf32, #tpu.memory_space<vmem>>, %arg6: memref<1x128xbf16, #tpu.memory_space<vmem>>, %arg7: memref<1x1xf32, #tpu.memory_space<smem>>, %arg8: memref<1x1x8xf32, #tpu.memory_space<vmem>>) attributes {dimension_semantics = [#tpu.dimension_semantics<parallel>], iteration_bounds = array<i64: 1>, scalar_prefetch = 0 : i64, scratch_operands = 0 : i64, tpu.core_type = #tpu.core_type<tc>, window_params = [{transform_indices = @transform_0, window_bounds = array<i64: 8, 16>}, {pipeline_mode = #tpu.pipeline_mode<synchronous>, transform_indices = @transform_1, window_bounds = array<i64: 16, 128>}, {pipeline_mode = #tpu.pipeline_mode<synchronous>, transform_indices = @transform_2, window_bounds = array<i64: 1, 128>}, {pipeline_mode = #tpu.pipeline_mode<synchronous>, transform_indices = @transform_3, window_bounds = array<i64: 128, 128>}, {pipeline_mode = #tpu.pipeline_mode<synchronous>, transform_indices = @transform_4, window_bounds = array<i64: 1, 128>}, {pipeline_mode = #tpu.pipeline_mode<synchronous>, transform_indices = @transform_5, window_bounds = array<i64: 1, 128>}, {transform_indices = @transform_6, window_bounds = array<i64: 1, 1>}, {transform_indices = @transform_7, window_bounds = array<i64: 1, 1, 8>}]} {
    %c0 = arith.constant 0 : index
    %c0_0 = arith.constant 0 : index
    %0 = vector.load %arg1[%c0, %c0_0] : memref<8x16xf32, #tpu.memory_space<vmem>>, vector<8x16xf32>
    %1 = arith.truncf %0 : vector<8x16xf32> to vector<8x16xbf16>
    %c0_1 = arith.constant 0 : index
    %c0_2 = arith.constant 0 : index
    %2 = vector.load %arg2[%c0_1, %c0_2] : memref<16x128xbf16, #tpu.memory_space<vmem>>, vector<16x128xbf16>
    %cst = arith.constant dense<0.000000e+00> : vector<8x128xf32>
    %3 = tpu.matmul %1, %2, %cst {dimension_numbers = #tpu.dot_dimension_numbers<[1], [0], [0], [1], [0, 0, 1, 1], [], []>} : vector<8x16xbf16>, vector<16x128xbf16>, vector<8x128xf32> -> vector<8x128xf32>
    %c0_3 = arith.constant 0 : index
    %c0_4 = arith.constant 0 : index
    %4 = vector.load %arg3[%c0_3, %c0_4] : memref<1x128xf32, #tpu.memory_space<vmem>>, vector<1x128xf32>
    %5 = vector.broadcast %4 : vector<1x128xf32> to vector<8x128xf32>
    %6 = arith.addf %3, %5 : vector<8x128xf32>
    %cst_5 = arith.constant 0.000000e+00 : f32
    %7 = vector.broadcast %cst_5 : f32 to vector<8x128xf32>
    %8 = arith.maximumf %6, %7 : vector<8x128xf32>
    %9 = arith.truncf %8 : vector<8x128xf32> to vector<8x128xbf16>
    %c0_6 = arith.constant 0 : index
    %c0_7 = arith.constant 0 : index
    %10 = vector.load %arg4[%c0_6, %c0_7] : memref<128x128xbf16, #tpu.memory_space<vmem>>, vector<128x128xbf16>
    %cst_8 = arith.constant dense<0.000000e+00> : vector<8x128xf32>
    %11 = tpu.matmul %9, %10, %cst_8 {dimension_numbers = #tpu.dot_dimension_numbers<[1], [0], [0], [1], [0, 0, 1, 1], [], []>} : vector<8x128xbf16>, vector<128x128xbf16>, vector<8x128xf32> -> vector<8x128xf32>
    %c0_9 = arith.constant 0 : index
    %c0_10 = arith.constant 0 : index
    %12 = vector.load %arg5[%c0_9, %c0_10] : memref<1x128xf32, #tpu.memory_space<vmem>>, vector<1x128xf32>
    %13 = vector.broadcast %12 : vector<1x128xf32> to vector<8x128xf32>
    %14 = arith.addf %11, %13 : vector<8x128xf32>
    %cst_11 = arith.constant 0.000000e+00 : f32
    %15 = vector.broadcast %cst_11 : f32 to vector<8x128xf32>
    %16 = arith.maximumf %14, %15 : vector<8x128xf32>
    %c0_12 = arith.constant 0 : index
    %c0_13 = arith.constant 0 : index
    %17 = vector.load %arg6[%c0_12, %c0_13] : memref<1x128xbf16, #tpu.memory_space<vmem>>, vector<1x128xbf16>
    %18 = arith.truncf %16 : vector<8x128xf32> to vector<8x128xbf16>
    %cst_14 = arith.constant dense<0.000000e+00> : vector<1x8xf32>
    %19 = tpu.matmul %17, %18, %cst_14 {dimension_numbers = #tpu.dot_dimension_numbers<[1], [1], [0], [0], [0, 0, 1, 0], [], []>} : vector<1x128xbf16>, vector<8x128xbf16>, vector<1x8xf32> -> vector<1x8xf32>
    %c0_15 = arith.constant 0 : index
    %c0_16 = arith.constant 0 : index
    %20 = memref.load %arg7[%c0_15, %c0_16] : memref<1x1xf32, #tpu.memory_space<smem>>
    %21 = vector.broadcast %20 : f32 to vector<1x8xf32>
    %22 = arith.addf %19, %21 : vector<1x8xf32>
    %23 = vector.shape_cast %22 : vector<1x8xf32> to vector<1x1x8xf32>
    %c0_17 = arith.constant 0 : index
    %c0_18 = arith.constant 0 : index
    %c0_19 = arith.constant 0 : index
    %24 = vector.load %arg8[%c0_17, %c0_18, %c0_19] : memref<1x1x8xf32, #tpu.memory_space<vmem>>, vector<1x1x8xf32>
    tpu.vector_store %arg8[%c0_17, %c0_18, %c0_19], %23 {strides = array<i32>} : memref<1x1x8xf32, #tpu.memory_space<vmem>>, vector<1x1x8xf32>,
    return
  }
  func.func @transform_0(%arg0: i32) -> (i32, i32) {
    %c0_i32 = arith.constant 0 : i32
    %c0_i32_0 = arith.constant 0 : i32
    return %arg0, %c0_i32 : i32, i32
  }
  func.func @transform_1(%arg0: i32) -> (i32, i32) {
    %c0_i32 = arith.constant 0 : i32
    %c0_i32_0 = arith.constant 0 : i32
    %c0_i32_1 = arith.constant 0 : i32
    return %c0_i32, %c0_i32_0 : i32, i32
  }
  func.func @transform_2(%arg0: i32) -> (i32, i32) {
    %c0_i32 = arith.constant 0 : i32
    %c0_i32_0 = arith.constant 0 : i32
    %c0_i32_1 = arith.constant 0 : i32
    return %c0_i32, %c0_i32_0 : i32, i32
  }
  func.func @transform_3(%arg0: i32) -> (i32, i32) {
    %c0_i32 = arith.constant 0 : i32
    %c0_i32_0 = arith.constant 0 : i32
    %c0_i32_1 = arith.constant 0 : i32
    return %c0_i32, %c0_i32_0 : i32, i32
  }
  func.func @transform_4(%arg0: i32) -> (i32, i32) {
    %c0_i32 = arith.constant 0 : i32
    %c0_i32_0 = arith.constant 0 : i32
    %c0_i32_1 = arith.constant 0 : i32
    return %c0_i32, %c0_i32_0 : i32, i32
  }
  func.func @transform_5(%arg0: i32) -> (i32, i32) {
    %c0_i32 = arith.constant 0 : i32
    %c0_i32_0 = arith.constant 0 : i32
    %c0_i32_1 = arith.constant 0 : i32
    return %c0_i32, %c0_i32_0 : i32, i32
  }
  func.func @transform_6(%arg0: i32) -> (i32, i32) {
    %c0_i32 = arith.constant 0 : i32
    %c0_i32_0 = arith.constant 0 : i32
    %c0_i32_1 = arith.constant 0 : i32
    return %c0_i32, %c0_i32_0 : i32, i32
  }
  func.func @transform_7(%arg0: i32) -> (i32, i32, i32) {
    %c0_i32 = arith.constant 0 : i32
    %c0_i32_0 = arith.constant 0 : i32
    %c0_i32_1 = arith.constant 0 : i32
    return %arg0, %c0_i32, %c0_i32_0 : i32, i32, i32
  }
}

module attributes {stable_mosaic.version = 11 : i64} {
  func.func @_value_mlp_kernel(%arg0: i32, %arg1: memref<8x16xf32, #tpu.memory_space<vmem>>, %arg2: memref<16x128xbf16, #tpu.memory_space<vmem>>, %arg3: memref<1x128xf32, #tpu.memory_space<vmem>>, %arg4: memref<128x128xbf16, #tpu.memory_space<vmem>>, %arg5: memref<1x128xf32, #tpu.memory_space<vmem>>, %arg6: memref<1x128xbf16, #tpu.memory_space<vmem>>, %arg7: memref<1x1xf32, #tpu.memory_space<smem>>, %arg8: memref<1x1x8xf32, #tpu.memory_space<vmem>>) attributes {dimension_semantics = [#tpu.dimension_semantics<parallel>], iteration_bounds = array<i64: 1>, scalar_prefetch = 0 : i64, scratch_operands = 0 : i64, tpu.core_type = #tpu.core_type<tc>, window_params = [{transform_indices = @transform_0, window_bounds = array<i64: 8, 16>}, {pipeline_mode = #tpu.pipeline_mode<synchronous>, transform_indices = @transform_1, window_bounds = array<i64: 16, 128>}, {pipeline_mode = #tpu.pipeline_mode<synchronous>, transform_indices = @transform_2, window_bounds = array<i64: 1, 128>}, {pipeline_mode = #tpu.pipeline_mode<synchronous>, transform_indices = @transform_3, window_bounds = array<i64: 128, 128>}, {pipeline_mode = #tpu.pipeline_mode<synchronous>, transform_indices = @transform_4, window_bounds = array<i64: 1, 128>}, {pipeline_mode = #tpu.pipeline_mode<synchronous>, transform_indices = @transform_5, window_bounds = array<i64: 1, 128>}, {transform_indices = @transform_6, window_bounds = array<i64: 1, 1>}, {transform_indices = @transform_7, window_bounds = array<i64: 1, 1, 8>}]} {
    %c0 = arith.constant 0 : index
    %c0_0 = arith.constant 0 : index
    %0 = vector.load %arg1[%c0, %c0_0] : memref<8x16xf32, #tpu.memory_space<vmem>>, vector<8x16xf32>
    %1 = arith.truncf %0 : vector<8x16xf32> to vector<8x16xbf16>
    %c0_1 = arith.constant 0 : index
    %c0_2 = arith.constant 0 : index
    %2 = vector.load %arg2[%c0_1, %c0_2] : memref<16x128xbf16, #tpu.memory_space<vmem>>, vector<16x128xbf16>
    %cst = arith.constant dense<0.000000e+00> : vector<8x128xf32>
    %3 = tpu.matmul %1, %2, %cst {dimension_numbers = #tpu.dot_dimension_numbers<[1], [0], [0], [1], [0, 0, 1, 1], [], []>} : vector<8x16xbf16>, vector<16x128xbf16>, vector<8x128xf32> -> vector<8x128xf32>
    %c0_3 = arith.constant 0 : index
    %c0_4 = arith.constant 0 : index
    %4 = vector.load %arg3[%c0_3, %c0_4] : memref<1x128xf32, #tpu.memory_space<vmem>>, vector<1x128xf32>
    %5 = vector.broadcast %4 : vector<1x128xf32> to vector<8x128xf32>
    %6 = arith.addf %3, %5 : vector<8x128xf32>
    %cst_5 = arith.constant 0.000000e+00 : f32
    %7 = vector.broadcast %cst_5 : f32 to vector<8x128xf32>
    %8 = arith.maximumf %6, %7 : vector<8x128xf32>
    %9 = arith.truncf %8 : vector<8x128xf32> to vector<8x128xbf16>
    %c0_6 = arith.constant 0 : index
    %c0_7 = arith.constant 0 : index
    %10 = vector.load %arg4[%c0_6, %c0_7] : memref<128x128xbf16, #tpu.memory_space<vmem>>, vector<128x128xbf16>
    %cst_8 = arith.constant dense<0.000000e+00> : vector<8x128xf32>
    %11 = tpu.matmul %9, %10, %cst_8 {dimension_numbers = #tpu.dot_dimension_numbers<[1], [0], [0], [1], [0, 0, 1, 1], [], []>} : vector<8x128xbf16>, vector<128x128xbf16>, vector<8x128xf32> -> vector<8x128xf32>
    %c0_9 = arith.constant 0 : index
    %c0_10 = arith.constant 0 : index
    %12 = vector.load %arg5[%c0_9, %c0_10] : memref<1x128xf32, #tpu.memory_space<vmem>>, vector<1x128xf32>
    %13 = vector.broadcast %12 : vector<1x128xf32> to vector<8x128xf32>
    %14 = arith.addf %11, %13 : vector<8x128xf32>
    %cst_11 = arith.constant 0.000000e+00 : f32
    %15 = vector.broadcast %cst_11 : f32 to vector<8x128xf32>
    %16 = arith.maximumf %14, %15 : vector<8x128xf32>
    %c0_12 = arith.constant 0 : index
    %c0_13 = arith.constant 0 : index
    %17 = vector.load %arg6[%c0_12, %c0_13] : memref<1x128xbf16, #tpu.memory_space<vmem>>, vector<1x128xbf16>
    %18 = arith.truncf %16 : vector<8x128xf32> to vector<8x128xbf16>
    %cst_14 = arith.constant dense<0.000000e+00> : vector<1x8xf32>
    %19 = tpu.matmul %17, %18, %cst_14 {dimension_numbers = #tpu.dot_dimension_numbers<[1], [1], [0], [0], [0, 0, 1, 0], [], []>} : vector<1x128xbf16>, vector<8x128xbf16>, vector<1x8xf32> -> vector<1x8xf32>
    %c0_15 = arith.constant 0 : index
    %c0_16 = arith.constant 0 : index
    %20 = memref.load %arg7[%c0_15, %c0_16] : memref<1x1xf32, #tpu.memory_space<smem>>
    %21 = vector.broadcast %20 : f32 to vector<1x8xf32>
    %22 = arith.addf %19, %21 : vector<1x8xf32>
    %23 = vector.shape_cast %22 : vector<1x8xf32> to vector<1x1x8xf32>
    %c0_17 = arith.constant 0 : index
    %c0_18 = arith.constant 0 : index
    %c0_19 = arith.constant 0 : index
    %24 = vector.load %arg8[%c0_17, %c0_18, %c0_19] : memref<1x1x8xf32, #tpu.memory_space<vmem>>, vector<1x1x8xf32>
    tpu.vector_store %arg8[%c0_17, %c0_18, %c0_19], %23 {strides = array<i32>} : memref<1x1x8xf32, #tpu.memory_space<vmem>>, vector<1x1x8xf32>,
    return
  }
  func.func @transform_0(%arg0: i32) -> (i32, i32) {
    %c0_i32 = arith.constant 0 : i32
    %c0_i32_0 = arith.constant 0 : i32
    return %arg0, %c0_i32 : i32, i32
  }
  func.func @transform_1(%arg0: i32) -> (i32, i32) {
    %c0_i32 = arith.constant 0 : i32
    %c0_i32_0 = arith.constant 0 : i32
    %c0_i32_1 = arith.constant 0 : i32
    return %c0_i32, %c0_i32_0 : i32, i32
  }
  func.func @transform_2(%arg0: i32) -> (i32, i32) {
    %c0_i32 = arith.constant 0 : i32
    %c0_i32_0 = arith.constant 0 : i32
    %c0_i32_1 = arith.constant 0 : i32
    return %c0_i32, %c0_i32_0 : i32, i32
  }
  func.func @transform_3(%arg0: i32) -> (i32, i32) {
    %c0_i32 = arith.constant 0 : i32
    %c0_i32_0 = arith.constant 0 : i32
    %c0_i32_1 = arith.constant 0 : i32
    return %c0_i32, %c0_i32_0 : i32, i32
  }
  func.func @transform_4(%arg0: i32) -> (i32, i32) {
    %c0_i32 = arith.constant 0 : i32
    %c0_i32_0 = arith.constant 0 : i32
    %c0_i32_1 = arith.constant 0 : i32
    return %c0_i32, %c0_i32_0 : i32, i32
  }
  func.func @transform_5(%arg0: i32) -> (i32, i32) {
    %c0_i32 = arith.constant 0 : i32
    %c0_i32_0 = arith.constant 0 : i32
    %c0_i32_1 = arith.constant 0 : i32
    return %c0_i32, %c0_i32_0 : i32, i32
  }
  func.func @transform_6(%arg0: i32) -> (i32, i32) {
    %c0_i32 = arith.constant 0 : i32
    %c0_i32_0 = arith.constant 0 : i32
    %c0_i32_1 = arith.constant 0 : i32
    return %c0_i32, %c0_i32_0 : i32, i32
  }
  func.func @transform_7(%arg0: i32) -> (i32, i32, i32) {
    %c0_i32 = arith.constant 0 : i32
    %c0_i32_0 = arith.constant 0 : i32
    %c0_i32_1 = arith.constant 0 : i32
    return %arg0, %c0_i32, %c0_i32_0 : i32, i32, i32
  }
}

</mosaic_0001>

<bundles_post_ra>
// kernel: tpu_custom_call.1
= control target key start
LH: loop header
LB: loop body
LE: loop exit
PB: predicated region body
PF: predicated region fallthrough
CT: control target
= control target key end

     0   :  { %13 = vsyncpa [#allocation4], 0  ;;  %s587_s0 = inlined_call_operand.hbm [shape: f32[8,16], index: 0, kind: input, shape index: {}]   ;;  %s588_s1 = inlined_call_operand.hbm [shape: bf16[16,128], index: 1, kind: input, shape index: {}]   ;;  %s589_s2 = inlined_call_operand.vmem [shape: f32[1,128], index: 2, kind: input, shape index: {}]   ;;  %s590_s3 = inlined_call_operand.hbm [shape: bf16[128,128], index: 3, kind: input, shape index: {}]   ;;  %s591_s4 = inlined_call_operand.vmem [shape: f32[1,128], index: 4, kind: input, shape index: {}]   ;;  %s592_s5 = inlined_call_operand.vmem [shape: bf16[1,128], index: 5, kind: input, shape index: {}]   ;;  %s593_s6 = inlined_call_operand.<no memory space> [shape: f32[1,1], index: 6, kind: input, shape index: {}]   ;;  %s594_s7 = inlined_call_operand.hbm [shape: f32[1,1,8], index: 7, kind: output, shape index: {}]  }
   0x1   :  { %14 = vsyncpa [#allocation7], 0 }
   0x2   :  { %15 = vsyncpa [#allocation5], 0  ;;  %s473_s24 = smov [#allocation6]   ;;  %s379_s28 = scalar_lea.hbm %s588_s1, 128 }
   0x3   :  { %s31_s25 = sshll.u32 %s473_s24, 4  ;;  %p380_p0 = scmp.ne.s32.totalorder %s588_s1, %s379_s28  ;;  %s32_s25 = int_to_ptr.vmem [resolvable:$true] %s31_s25 }
   0x4   :  { %p383_p1 = scmp.lt.u32.totalorder %s379_s28, %s588_s1 }
   0x6   :  { %p385_p2 = pnand %p383_p1, %p380_p0 }
   0x8   :  { %388 = shalt.err (!%p385_p2)
}
   0x9   :  { %s389_s10 = scalar_lea.vmem %s32_s25, 128  ;;  %p394_p4 = scmp.lt.s32.totalorder %s32_s25, %s32_s25 }
   0xa   :  { %p390_p3 = scmp.ne.s32.totalorder %s32_s25, %s389_s10  ;;  %p395_p5 = scmp.lt.s32.totalorder %s389_s10, %s389_s10 }
   0xc   :  { %p396_p6 = por %p395_p5, %p394_p4 }
   0xe   :  { %p397_p7 = pnand %p396_p6, %p390_p3 }
  0x10   :  { %400 = shalt.err (!%p397_p7)
}
  0x11   :  { %s474_s11 = smov 64   ;;  %s475_s12 = smov 4  }
  0x12   :  { %37 = dma.hbm_to_vmem [thread:$0]  %s588_s1, 128, %s32_s25, [#allocation7], %s474_s11, %s474_s11, %s475_s12  }
  0x13   :  { %s476_s15 = smov [#allocation3]   ;;  %s477_s17 = smov [#allocation8]  }
  0x14   :  { %s22_s16 = sshll.u32 %s476_s15, 4  ;;  %s45_s18 = sshll.u32 %s477_s17, 4  ;;  %s23_s16 = int_to_ptr.vmem [resolvable:$true] %s22_s16  ;;  %s46_s18 = int_to_ptr.vmem [resolvable:$true] %s45_s18 }
  0x15   :  { %s401_s21 = scalar_lea.hbm %s587_s0, 128 }
  0x16   :  { %p402_p8 = scmp.ne.s32.totalorder %s587_s0, %s401_s21  ;;  %p405_p9 = scmp.lt.u32.totalorder %s401_s21, %s587_s0 }
  0x18   :  { %p407_p10 = pnand %p405_p9, %p402_p8 }
  0x1a   :  { %410 = shalt.err (!%p407_p10)
}
  0x1b   :  { %s411_s1 = scalar_lea.vmem %s23_s16, 128  ;;  %p416_p12 = scmp.lt.s32.totalorder %s23_s16, %s23_s16 }
  0x1c   :  { %p412_p11 = scmp.ne.s32.totalorder %s23_s16, %s411_s1  ;;  %p417_p13 = scmp.lt.s32.totalorder %s411_s1, %s411_s1 }
  0x1e   :  { %p418_p0 = por %p417_p13, %p416_p12 }
  0x20   :  { %p419_p1 = pnand %p418_p0, %p412_p11 }
  0x22   :  { %422 = shalt.err (!%p419_p1)
}
  0x23   :  { %25 = dma.hbm_to_vmem [thread:$0]  %s587_s0, 128, %s23_s16, [#allocation4]  }
  0x24   :  { %s423_s30 = scalar_lea.hbm %s590_s3, 1024 }
  0x25   :  { %p424_p2 = scmp.ne.s32.totalorder %s590_s3, %s423_s30  ;;  %p427_p3 = scmp.lt.u32.totalorder %s423_s30, %s590_s3 }
  0x27   :  { %p429_p4 = pnand %p427_p3, %p424_p2 }
  0x29   :  { %432 = shalt.err (!%p429_p4)
}
  0x2a   :  { %s433_s14 = scalar_lea.vmem %s46_s18, 1024  ;;  %p438_p6 = scmp.lt.s32.totalorder %s46_s18, %s46_s18 }
  0x2b   :  { %p434_p5 = scmp.ne.s32.totalorder %s46_s18, %s433_s14  ;;  %p439_p7 = scmp.lt.s32.totalorder %s433_s14, %s433_s14 }
  0x2d   :  { %p440_p8 = por %p439_p7, %p438_p6 }
  0x2f   :  { %p441_p9 = pnand %p440_p8, %p434_p5 }
  0x31   :  { %444 = shalt.err (!%p441_p9)
}
  0x32   :  { %51 = dma.hbm_to_vmem [thread:$0]  %s590_s3, 1024, %s46_s18, [#allocation7], %s474_s11, %s474_s11, %s475_s12  }
  0x33   :  { %467 = dma.done.wait [#allocation4], 128  }
  0x34   :  { %468 = vsyncadd [#allocation4], 4294967168 }
  0x35   :  { %469 = dma.done.wait [#allocation7], 1152  }
  0x36   :  { %470 = vsyncadd [#allocation7], 4294966144  ;;  %v478_v0 = vmov 0.0   ;;  %vm479_vm0 = vmmov 0   ;;  %v370_v1 = vld [vmem:[#allocation6] sm:$0xff]   ;;  %v68_v2 = vld [vmem:[#allocation3] sm:$0xff]  ;;  %v246_v29 = vstv %s593_s6 }
  0x37   :  { %330 = vmatprep.subr.bf16.mxu0 %v478_v0  ;;  %332 = vmatprep.mubr.msk.bf16.mxu0 %vm479_vm0, %v478_v0  ;;  %v69_v3 = vpack.c.bf16 %v68_v2, %v68_v2  ;;  %vm85_vm1 = vcmask 130048   ;;  %v371_v4 = vld [vmem:[#allocation8] sm:$0xff]   ;;  %v372_v5 = vld [vmem:[#allocation8 + $0x8] sm:$0xff]   ;;  %v373_v6 = vld [vmem:[#allocation8 + $0x10] sm:$0xff]   ;;  %s480_s20 = smov [#allocation9]   ;;  %vm287_vm2 = vcmask 57344  }
  0x38   :  { %336 = vmatprep.subr.bf16.mxu1 %v478_v0  ;;  %352 = vmatprep.mubr.msk.bf16.mxu1 %vm479_vm0, %v478_v0  ;;  %v374_v7 = vld [vmem:[#allocation8 + $0x18] sm:$0xff]   ;;  %v375_v8 = vld [vmem:[#allocation8 + $0x20] sm:$0xff]   ;;  %v376_v9 = vld [vmem:[#allocation8 + $0x28] sm:$0xff]   ;;  %s295_s21 = sshll.u32 %s480_s20, 4  ;;  %s296_s21 = int_to_ptr.vmem [resolvable:$true] %s295_s21 }
  0x39   :  { %331 = vmatpush3.bf16.msra.mxu0 %v370_v1  ;;  %337 = vmatpush3.bf16.msra.mxu1 %v371_v4  ;;  %v377_v10 = vld [vmem:[#allocation8 + $0x30] sm:$0xff]   ;;  %v378_v11 = vld [vmem:[#allocation8 + $0x38] sm:$0xff]   ;;  %s449_s22 = scalar_lea.vmem %s296_s21, 32  ;;  %p450_p11 = scmp.lt.s32.totalorder %s296_s21, %s296_s21 }
  0x3a   :  { %356 = vmatprep.subr.bf16.mxu0 %v478_v0  ;;  %338 = vmatprep.subr.bf16.mxu1 %v478_v0  ;;  %v305_v12 = vld [vmem:[%s589_s2] ss:$0 sm:$0xff] }
  0x3b   :  { %v308_v20 = vld [vmem:[%s591_s4] ss:$0 sm:$0xff]  ;;  %s445_s4 = scalar_lea.vmem %s296_s21, 16 }
  0x3c   :  { %333 = vmatmul.mubr.msk.bf16.vlgmr.msra.gmra.mrb[0].mxu0 %vm85_vm1, %v69_v3  ;;  %v243_v28 = vld [vmem:[%s592_s5] sm:$0x1]  ;;  %p446_p10 = scmp.ne.s32.totalorder %s296_s21, %s445_s4  ;;  %p451_p12 = scmp.lt.s32.totalorder %s449_s22, %s445_s4 }
  0x3d   :  { %358 = vmatprep.mubr.msk.bf16.mxu0 %vm479_vm0, %v478_v0  ;;  %339 = vmatpush3.bf16.msra.mxu1 %v372_v5 }
  0x3e   :  { %340 = vmatprep.subr.bf16.mxu1 %v478_v0  ;;  %p452_p13 = por %p451_p12, %p450_p11 }
  0x40   :  { %p453_p0 = pnand %p452_p13, %p446_p10 }
  0x41   :  { %341 = vmatpush3.bf16.msra.mxu1 %v373_v6 }
  0x42   :  { %342 = vmatprep.subr.bf16.mxu1 %v478_v0 }
  0x45   :  { %343 = vmatpush3.bf16.msra.mxu1 %v374_v7 }
  0x46   :  { %344 = vmatprep.subr.bf16.mxu1 %v478_v0 }
  0x49   :  { %345 = vmatpush3.bf16.msra.mxu1 %v375_v8 }
  0x4a   :  { %346 = vmatprep.subr.bf16.mxu1 %v478_v0 }
  0x4d   :  { %347 = vmatpush3.bf16.msra.mxu1 %v376_v9 }
  0x4e   :  { %348 = vmatprep.subr.bf16.mxu1 %v478_v0 }
  0x51   :  { %349 = vmatpush3.bf16.msra.mxu1 %v377_v10 }
  0x52   :  { %350 = vmatprep.subr.bf16.mxu1 %v478_v0 }
  0x55   :  { %351 = vmatpush3.bf16.msra.mxu1 %v378_v11 }
 0x10f   :  { %v123_v13 = vpop.f32.mrb[0].mxu0 }
 0x110   :  { %v124_v14 = vadd.f32 %v305_v12, %v123_v13  ;;  %v334_v15 = vpop.f32.mrb[1].mxu0 }
 0x111   :  { %v126_v16 = vpop.f32.mrb[2].mxu0 }
 0x112   :  { %v129_v17 = vmax.f32 %v124_v14, 0.0  ;;  %v335_v18 = vpop.f32.mrb[3].mxu0 }
 0x114   :  { %v130_v19 = vpack.c.bf16 %v129_v17, %v129_v17 }
 0x116   :  { %353 = vmatmul.mubr.bf16.vlgmr.msra.gmra.mrb[0].mxu1 %v130_v19 }
 0x1e9   :  { %v236_v21 = vpop.f32.mrb[0].mxu1 }
 0x1ea   :  { %v237_v22 = vadd.f32 %v308_v20, %v236_v21  ;;  %v354_v23 = vpop.f32.mrb[1].mxu1 }
 0x1eb   :  { %v239_v24 = vpop.f32.mrb[2].mxu1 }
 0x1ec   :  { %v242_v25 = vmax.f32 %v237_v22, 0.0  ;;  %v355_v26 = vpop.f32.mrb[3].mxu1 }
 0x1ee   :  { %v244_v27 = vpack.c.bf16 %v242_v25, %v242_v25 }
 0x1f0   :  { %357 = vmatpush3.bf16.xpose.msra.mxu0 %v244_v27 }
 0x1f7   :  { %359 = vmatmul.mubr.bf16.vlgmr.msra.gmra.mrb[4].mxu0 %v243_v28 }
 0x2ca   :  { %v281_v30 = vpop.f32.mrb[4].mxu0 }
 0x2cb   :  { %v282_v31 = vadd.f32 %v281_v30, %v246_v29  ;;  %v360_v32 = vpop.f32.mrb[5].mxu0 }
 0x2cc   :  { %v284_v33 = vpop.f32.mrb[6].mxu0 }
 0x2cd   :  { %v361_v34 = vpop.f32.mrb[7].mxu0  ;;  %288 = vst.msk [vmem:[#allocation9] sm:$0x1] %vm287_vm2, %v282_v31 }
 0x2ce   :  { %456 = shalt.err (!%p453_p0)
}
 0x2cf   :  { %s457_s23 = scalar_lea.hbm %s594_s7, 16 }
 0x2d0   :  { %p458_p1 = scmp.ne.s32.totalorder %s594_s7, %s457_s23  ;;  %p461_p2 = scmp.lt.u32.totalorder %s457_s23, %s594_s7 }
 0x2d2   :  { %p463_p3 = pnand %p461_p2, %p458_p1 }
 0x2d4   :  { %466 = shalt.err (!%p463_p3)
}
 0x2d5   :  { %298 = dma.vmem_to_hbm [thread:$0]  %s296_s21, 16, %s594_s7, [#allocation5]  }
 0x2d6   :  { %471 = dma.done.wait [#allocation5], 16  }
 0x2d7   :  { %472 = vsyncadd [#allocation5], 4294967280 }
 0x2d8   :  { %302 = vsyncpa [#allocation4], 1 }
 0x2d9   :  { %303 = vsyncpa [#allocation7], 1 }
 0x2da   :  { %304 = vsyncpa [#allocation5], 1 }

// kernel: tpu_custom_call.1
= control target key start
LH: loop header
LB: loop body
LE: loop exit
PB: predicated region body
PF: predicated region fallthrough
CT: control target
= control target key end

     0   :  { %13 = vsyncpa [#allocation4], 0  ;;  %s587_s0 = inlined_call_operand.hbm [shape: f32[8,16], index: 0, kind: input, shape index: {}]   ;;  %s588_s1 = inlined_call_operand.hbm [shape: bf16[16,128], index: 1, kind: input, shape index: {}]   ;;  %s589_s2 = inlined_call_operand.vmem [shape: f32[1,128], index: 2, kind: input, shape index: {}]   ;;  %s590_s3 = inlined_call_operand.hbm [shape: bf16[128,128], index: 3, kind: input, shape index: {}]   ;;  %s591_s4 = inlined_call_operand.vmem [shape: f32[1,128], index: 4, kind: input, shape index: {}]   ;;  %s592_s5 = inlined_call_operand.vmem [shape: bf16[1,128], index: 5, kind: input, shape index: {}]   ;;  %s593_s6 = inlined_call_operand.<no memory space> [shape: f32[1,1], index: 6, kind: input, shape index: {}]   ;;  %s594_s7 = inlined_call_operand.hbm [shape: f32[1,1,8], index: 7, kind: output, shape index: {}]  }
   0x1   :  { %14 = vsyncpa [#allocation7], 0 }
   0x2   :  { %15 = vsyncpa [#allocation5], 0  ;;  %s473_s24 = smov [#allocation6]   ;;  %s379_s28 = scalar_lea.hbm %s588_s1, 128 }
   0x3   :  { %s31_s25 = sshll.u32 %s473_s24, 4  ;;  %p380_p0 = scmp.ne.s32.totalorder %s588_s1, %s379_s28  ;;  %s32_s25 = int_to_ptr.vmem [resolvable:$true] %s31_s25 }
   0x4   :  { %p383_p1 = scmp.lt.u32.totalorder %s379_s28, %s588_s1 }
   0x6   :  { %p385_p2 = pnand %p383_p1, %p380_p0 }
   0x8   :  { %388 = shalt.err (!%p385_p2)
}
   0x9   :  { %s389_s10 = scalar_lea.vmem %s32_s25, 128  ;;  %p394_p4 = scmp.lt.s32.totalorder %s32_s25, %s32_s25 }
   0xa   :  { %p390_p3 = scmp.ne.s32.totalorder %s32_s25, %s389_s10  ;;  %p395_p5 = scmp.lt.s32.totalorder %s389_s10, %s389_s10 }
   0xc   :  { %p396_p6 = por %p395_p5, %p394_p4 }
   0xe   :  { %p397_p7 = pnand %p396_p6, %p390_p3 }
  0x10   :  { %400 = shalt.err (!%p397_p7)
}
  0x11   :  { %s474_s11 = smov 64   ;;  %s475_s12 = smov 4  }
  0x12   :  { %37 = dma.hbm_to_vmem [thread:$0]  %s588_s1, 128, %s32_s25, [#allocation7], %s474_s11, %s474_s11, %s475_s12  }
  0x13   :  { %s476_s15 = smov [#allocation3]   ;;  %s477_s17 = smov [#allocation8]  }
  0x14   :  { %s22_s16 = sshll.u32 %s476_s15, 4  ;;  %s45_s18 = sshll.u32 %s477_s17, 4  ;;  %s23_s16 = int_to_ptr.vmem [resolvable:$true] %s22_s16  ;;  %s46_s18 = int_to_ptr.vmem [resolvable:$true] %s45_s18 }
  0x15   :  { %s401_s21 = scalar_lea.hbm %s587_s0, 128 }
  0x16   :  { %p402_p8 = scmp.ne.s32.totalorder %s587_s0, %s401_s21  ;;  %p405_p9 = scmp.lt.u32.totalorder %s401_s21, %s587_s0 }
  0x18   :  { %p407_p10 = pnand %p405_p9, %p402_p8 }
  0x1a   :  { %410 = shalt.err (!%p407_p10)
}
  0x1b   :  { %s411_s1 = scalar_lea.vmem %s23_s16, 128  ;;  %p416_p12 = scmp.lt.s32.totalorder %s23_s16, %s23_s16 }
  0x1c   :  { %p412_p11 = scmp.ne.s32.totalorder %s23_s16, %s411_s1  ;;  %p417_p13 = scmp.lt.s32.totalorder %s411_s1, %s411_s1 }
  0x1e   :  { %p418_p0 = por %p417_p13, %p416_p12 }
  0x20   :  { %p419_p1 = pnand %p418_p0, %p412_p11 }
  0x22   :  { %422 = shalt.err (!%p419_p1)
}
  0x23   :  { %25 = dma.hbm_to_vmem [thread:$0]  %s587_s0, 128, %s23_s16, [#allocation4]  }
  0x24   :  { %s423_s30 = scalar_lea.hbm %s590_s3, 1024 }
  0x25   :  { %p424_p2 = scmp.ne.s32.totalorder %s590_s3, %s423_s30  ;;  %p427_p3 = scmp.lt.u32.totalorder %s423_s30, %s590_s3 }
  0x27   :  { %p429_p4 = pnand %p427_p3, %p424_p2 }
  0x29   :  { %432 = shalt.err (!%p429_p4)
}
  0x2a   :  { %s433_s14 = scalar_lea.vmem %s46_s18, 1024  ;;  %p438_p6 = scmp.lt.s32.totalorder %s46_s18, %s46_s18 }
  0x2b   :  { %p434_p5 = scmp.ne.s32.totalorder %s46_s18, %s433_s14  ;;  %p439_p7 = scmp.lt.s32.totalorder %s433_s14, %s433_s14 }
  0x2d   :  { %p440_p8 = por %p439_p7, %p438_p6 }
  0x2f   :  { %p441_p9 = pnand %p440_p8, %p434_p5 }
  0x31   :  { %444 = shalt.err (!%p441_p9)
}
  0x32   :  { %51 = dma.hbm_to_vmem [thread:$0]  %s590_s3, 1024, %s46_s18, [#allocation7], %s474_s11, %s474_s11, %s475_s12  }
  0x33   :  { %467 = dma.done.wait [#allocation4], 128  }
  0x34   :  { %468 = vsyncadd [#allocation4], 4294967168 }
  0x35   :  { %469 = dma.done.wait [#allocation7], 1152  }
  0x36   :  { %470 = vsyncadd [#allocation7], 4294966144  ;;  %v478_v0 = vmov 0.0   ;;  %vm479_vm0 = vmmov 0   ;;  %v370_v1 = vld [vmem:[#allocation6] sm:$0xff]   ;;  %v68_v2 = vld [vmem:[#allocation3] sm:$0xff]  ;;  %v246_v29 = vstv %s593_s6 }
  0x37   :  { %330 = vmatprep.subr.bf16.mxu0 %v478_v0  ;;  %332 = vmatprep.mubr.msk.bf16.mxu0 %vm479_vm0, %v478_v0  ;;  %v69_v3 = vpack.c.bf16 %v68_v2, %v68_v2  ;;  %vm85_vm1 = vcmask 130048   ;;  %v371_v4 = vld [vmem:[#allocation8] sm:$0xff]   ;;  %v372_v5 = vld [vmem:[#allocation8 + $0x8] sm:$0xff]   ;;  %v373_v6 = vld [vmem:[#allocation8 + $0x10] sm:$0xff]   ;;  %s480_s20 = smov [#allocation9]   ;;  %vm287_vm2 = vcmask 57344  }
  0x38   :  { %336 = vmatprep.subr.bf16.mxu1 %v478_v0  ;;  %352 = vmatprep.mubr.msk.bf16.mxu1 %vm479_vm0, %v478_v0  ;;  %v374_v7 = vld [vmem:[#allocation8 + $0x18] sm:$0xff]   ;;  %v375_v8 = vld [vmem:[#allocation8 + $0x20] sm:$0xff]   ;;  %v376_v9 = vld [vmem:[#allocation8 + $0x28] sm:$0xff]   ;;  %s295_s21 = sshll.u32 %s480_s20, 4  ;;  %s296_s21 = int_to_ptr.vmem [resolvable:$true] %s295_s21 }
  0x39   :  { %331 = vmatpush3.bf16.msra.mxu0 %v370_v1  ;;  %337 = vmatpush3.bf16.msra.mxu1 %v371_v4  ;;  %v377_v10 = vld [vmem:[#allocation8 + $0x30] sm:$0xff]   ;;  %v378_v11 = vld [vmem:[#allocation8 + $0x38] sm:$0xff]   ;;  %s449_s22 = scalar_lea.vmem %s296_s21, 32  ;;  %p450_p11 = scmp.lt.s32.totalorder %s296_s21, %s296_s21 }
  0x3a   :  { %356 = vmatprep.subr.bf16.mxu0 %v478_v0  ;;  %338 = vmatprep.subr.bf16.mxu1 %v478_v0  ;;  %v305_v12 = vld [vmem:[%s589_s2] ss:$0 sm:$0xff] }
  0x3b   :  { %v308_v20 = vld [vmem:[%s591_s4] ss:$0 sm:$0xff]  ;;  %s445_s4 = scalar_lea.vmem %s296_s21, 16 }
  0x3c   :  { %333 = vmatmul.mubr.msk.bf16.vlgmr.msra.gmra.mrb[0].mxu0 %vm85_vm1, %v69_v3  ;;  %v243_v28 = vld [vmem:[%s592_s5] sm:$0x1]  ;;  %p446_p10 = scmp.ne.s32.totalorder %s296_s21, %s445_s4  ;;  %p451_p12 = scmp.lt.s32.totalorder %s449_s22, %s445_s4 }
  0x3d   :  { %358 = vmatprep.mubr.msk.bf16.mxu0 %vm479_vm0, %v478_v0  ;;  %339 = vmatpush3.bf16.msra.mxu1 %v372_v5 }
  0x3e   :  { %340 = vmatprep.subr.bf16.mxu1 %v478_v0  ;;  %p452_p13 = por %p451_p12, %p450_p11 }
  0x40   :  { %p453_p0 = pnand %p452_p13, %p446_p10 }
  0x41   :  { %341 = vmatpush3.bf16.msra.mxu1 %v373_v6 }
  0x42   :  { %342 = vmatprep.subr.bf16.mxu1 %v478_v0 }
  0x45   :  { %343 = vmatpush3.bf16.msra.mxu1 %v374_v7 }
  0x46   :  { %344 = vmatprep.subr.bf16.mxu1 %v478_v0 }
  0x49   :  { %345 = vmatpush3.bf16.msra.mxu1 %v375_v8 }
  0x4a   :  { %346 = vmatprep.subr.bf16.mxu1 %v478_v0 }
  0x4d   :  { %347 = vmatpush3.bf16.msra.mxu1 %v376_v9 }
  0x4e   :  { %348 = vmatprep.subr.bf16.mxu1 %v478_v0 }
  0x51   :  { %349 = vmatpush3.bf16.msra.mxu1 %v377_v10 }
  0x52   :  { %350 = vmatprep.subr.bf16.mxu1 %v478_v0 }
  0x55   :  { %351 = vmatpush3.bf16.msra.mxu1 %v378_v11 }
 0x10f   :  { %v123_v13 = vpop.f32.mrb[0].mxu0 }
 0x110   :  { %v124_v14 = vadd.f32 %v305_v12, %v123_v13  ;;  %v334_v15 = vpop.f32.mrb[1].mxu0 }
 0x111   :  { %v126_v16 = vpop.f32.mrb[2].mxu0 }
 0x112   :  { %v129_v17 = vmax.f32 %v124_v14, 0.0  ;;  %v335_v18 = vpop.f32.mrb[3].mxu0 }
 0x114   :  { %v130_v19 = vpack.c.bf16 %v129_v17, %v129_v17 }
 0x116   :  { %353 = vmatmul.mubr.bf16.vlgmr.msra.gmra.mrb[0].mxu1 %v130_v19 }
 0x1e9   :  { %v236_v21 = vpop.f32.mrb[0].mxu1 }
 0x1ea   :  { %v237_v22 = vadd.f32 %v308_v20, %v236_v21  ;;  %v354_v23 = vpop.f32.mrb[1].mxu1 }
 0x1eb   :  { %v239_v24 = vpop.f32.mrb[2].mxu1 }
 0x1ec   :  { %v242_v25 = vmax.f32 %v237_v22, 0.0  ;;  %v355_v26 = vpop.f32.mrb[3].mxu1 }
 0x1ee   :  { %v244_v27 = vpack.c.bf16 %v242_v25, %v242_v25 }
 0x1f0   :  { %357 = vmatpush3.bf16.xpose.msra.mxu0 %v244_v27 }
 0x1f7   :  { %359 = vmatmul.mubr.bf16.vlgmr.msra.gmra.mrb[4].mxu0 %v243_v28 }
 0x2ca   :  { %v281_v30 = vpop.f32.mrb[4].mxu0 }
 0x2cb   :  { %v282_v31 = vadd.f32 %v281_v30, %v246_v29  ;;  %v360_v32 = vpop.f32.mrb[5].mxu0 }
 0x2cc   :  { %v284_v33 = vpop.f32.mrb[6].mxu0 }
 0x2cd   :  { %v361_v34 = vpop.f32.mrb[7].mxu0  ;;  %288 = vst.msk [vmem:[#allocation9] sm:$0x1] %vm287_vm2, %v282_v31 }
 0x2ce   :  { %456 = shalt.err (!%p453_p0)
}
 0x2cf   :  { %s457_s23 = scalar_lea.hbm %s594_s7, 16 }
 0x2d0   :  { %p458_p1 = scmp.ne.s32.totalorder %s594_s7, %s457_s23  ;;  %p461_p2 = scmp.lt.u32.totalorder %s457_s23, %s594_s7 }
 0x2d2   :  { %p463_p3 = pnand %p461_p2, %p458_p1 }
 0x2d4   :  { %466 = shalt.err (!%p463_p3)
}
 0x2d5   :  { %298 = dma.vmem_to_hbm [thread:$0]  %s296_s21, 16, %s594_s7, [#allocation5]  }
 0x2d6   :  { %471 = dma.done.wait [#allocation5], 16  }
 0x2d7   :  { %472 = vsyncadd [#allocation5], 4294967280 }
 0x2d8   :  { %302 = vsyncpa [#allocation4], 1 }
 0x2d9   :  { %303 = vsyncpa [#allocation7], 1 }
 0x2da   :  { %304 = vsyncpa [#allocation5], 1 }

</bundles_post_ra>
